<compile_context>
chip_gen: v5e
topology: v5e:2x2
jax: 0.10.0
libtpu: 0.0.40
codegen_flags: <defaults>
</compile_context>

<pallas_src>
import jax
import jax.numpy as jnp
from jax.experimental import pallas as pl
from jax.experimental.pallas import tpu as pltpu

_EPS = 1e-7


def _round_up(x, m):
    return ((x + m - 1) // m) * m


def _mlp_norm_kernel(x_ref, w1_ref, b1_ref, w2_ref, b2_ref, o_ref):
    """Fused Linear -> ReLU -> Linear -> row-wise L2 normalize for one row tile.

    Shapes (leading MLP-index dim squeezed away by the BlockSpecs):
      x: (tm, d_k)  w1: (d_k, d_h)  b1: (1, d_h)
      w2: (d_h, d_out)  b2: (1, d_out)  o: (tm, d_out)
    """
    # Layer 1: bf16 operands, f32 accumulation on the MXU.
    h = jnp.dot(x_ref[...], w1_ref[...], preferred_element_type=jnp.float32)
    h = h + b1_ref[...].astype(jnp.float32)
    # ReLU in f32 on the VPU, then cast straight back to the weight dtype so
    # only one (tm, d_out) f32 intermediate (y) is live at a time.
    h = jnp.maximum(h, 0.0).astype(w2_ref.dtype)

    # Layer 2.
    y = jnp.dot(h, w2_ref[...], preferred_element_type=jnp.float32)
    y = y + b2_ref[...].astype(jnp.float32)

    # out = y / (||y||_2 + eps); norm math in f32, EUP approx reciprocal
    # (its own VLIW slot; output is bf16 anyway so approx is plenty accurate).
    norm = jnp.sqrt(jnp.sum(y * y, axis=-1, keepdims=True))
    inv = pl.reciprocal(norm + _EPS, approx=True)
    o_ref[...] = (y * inv).astype(o_ref.dtype)


def projector_head_batched(xs, w1s, b1s, w2s, b2s, *, tm=256):
    """G MLP_Modules + L2-normalize in one pallas_call.

    xs: (G, N, d_k), w1s: (G, d_k, d_h), b1s: (G, 1, d_h),
    w2s: (G, d_h, d_out), b2s: (G, 1, d_out)  ->  (G, N, d_out)

    Grid = (MLP index, row tile); per-MLP weights are selected by the index_map
    and stay resident across the (inner) row axis.
    """
    g, n, d_k = xs.shape
    d_h = w1s.shape[-1]
    d_out = w2s.shape[-1]

    # Row tile: multiple of 8 sublanes; don't exceed the (rounded-up) row count
    # at small N, but no host-side padding / slicing -- Pallas masks the partial
    # last tile (grid = cdiv).
    tm = max(8, min(_round_up(tm, 8), _round_up(n, 8)))

    out = pl.pallas_call(
        _mlp_norm_kernel,
        out_shape=jax.ShapeDtypeStruct((g, n, d_out), xs.dtype),
        grid_spec=pltpu.PrefetchScalarGridSpec(
            num_scalar_prefetch=0,
            grid=(g, pl.cdiv(n, tm)),
            in_specs=[
                pl.BlockSpec((None, tm, d_k), lambda m, i: (m, i, 0)),     # x tile
                pl.BlockSpec((None, d_k, d_h), lambda m, i: (m, 0, 0)),    # W1 (resident over rows)
                pl.BlockSpec((None, 1, d_h), lambda m, i: (m, 0, 0)),      # b1
                pl.BlockSpec((None, d_h, d_out), lambda m, i: (m, 0, 0)),  # W2 (resident over rows)
                pl.BlockSpec((None, 1, d_out), lambda m, i: (m, 0, 0)),    # b2
            ],
            out_specs=pl.BlockSpec((None, tm, d_out), lambda m, i: (m, i, 0)),
        ),
        compiler_params=pltpu.CompilerParams(
            dimension_semantics=("parallel", "parallel")),
    )(xs, w1s, b1s, w2s, b2s)
    return out


def stack_projector_params(params):
    """One-time prep: zero-pad every W1 along K to the max d_in and stack.

    Zero-padded W1 rows contribute exactly 0, so padding the matching x columns
    with zeros leaves the first-layer result bit-identical in value.
    Do this ONCE (at init), not per forward call.
    """
    d_k = max(w1.shape[0] for (w1, _, _, _) in params)

    def pad_w1(w1):
        k = w1.shape[0]
        return w1 if k == d_k else jnp.pad(w1, ((0, d_k - k), (0, 0)))

    w1s = jnp.stack([pad_w1(w1) for (w1, _, _, _) in params])
    b1s = jnp.stack([b1 for (_, b1, _, _) in params])
    w2s = jnp.stack([w2 for (_, _, w2, _) in params])
    b2s = jnp.stack([b2 for (_, _, _, b2) in params])
    return w1s, b1s, w2s, b2s


def projector_head_forward(features, stacked_params, *, tm=256):
    """Projector_Head.forward on a list of [N, C_i] features.

    All MLPs whose features share a row count run as ONE pallas_call (normally
    all five). Features with C_i < d_k are zero-padded on the channel axis to
    match the zero-padded W1 K rows.
    """
    w1s, b1s, w2s, b2s = stacked_params
    g, d_k = w1s.shape[0], w1s.shape[1]
    assert len(features) == g

    feats = []
    for x in features:
        c = x.shape[-1]
        feats.append(x if c == d_k else jnp.pad(x, ((0, 0), (0, d_k - c))))

    outs = [None] * g
    groups = {}
    for i, x in enumerate(feats):
        groups.setdefault((x.shape[0], x.dtype), []).append(i)

    for idxs in groups.values():
        xs = jnp.stack([feats[i] for i in idxs])
        if len(idxs) == g:
            ws = (w1s, b1s, w2s, b2s)
        else:
            sel = jnp.asarray(idxs)  # rare fallback: features with differing N
            ws = (w1s[sel], b1s[sel], w2s[sel], b2s[sel])
        res = projector_head_batched(xs, *ws, tm=tm)
        for j, i in enumerate(idxs):
            outs[i] = res[j]
    return outs


def init_linear(key, d_in, d_out, dtype=jnp.bfloat16):
    """Synthetic init matching nn.Linear(d_in, d_out) shapes (W stored (d_in, d_out))."""
    kw, kb = jax.random.split(key)
    bound = 1.0 / float(d_in) ** 0.5
    w = jax.random.uniform(kw, (d_in, d_out), jnp.float32, -bound, bound).astype(dtype)
    b = jax.random.uniform(kb, (1, d_out), jnp.float32, -bound, bound).astype(dtype)
    return w, b


def init_projector_head(key, dtype=jnp.bfloat16):
    """Parameters for mlp_1..mlp_5 with the dims from Projector_Head.__init__."""
    in_dims = [3, 128, 256, 256, 256]
    hidden, out = 256, 256
    params = []
    keys = jax.random.split(key, 2 * len(in_dims))
    for i, d_in in enumerate(in_dims):
        w1, b1 = init_linear(keys[2 * i], d_in, hidden, dtype)
        w2, b2 = init_linear(keys[2 * i + 1], hidden, out, dtype)
        params.append((w1, b1, w2, b2))
    return params


def _reference(features, params):
    """Pure-JAX reference mirroring the kernel's precision choices."""
    outs = []
    for x, (w1, b1, w2, b2) in zip(features, params):
        xf = x.astype(jnp.float32)
        h = jnp.maximum(xf @ w1.astype(jnp.float32) + b1.astype(jnp.float32), 0.0)
        h = h.astype(w2.dtype).astype(jnp.float32)  # mirror the kernel's bf16 cast
        y = h @ w2.astype(jnp.float32) + b2.astype(jnp.float32)
        norm = jnp.sqrt(jnp.sum(y * y, axis=-1, keepdims=True))
        outs.append((y / (norm + _EPS)).astype(x.dtype))
    return outs


if __name__ == "__main__":
    key = jax.random.PRNGKey(0)
    k_params, k_feats = jax.random.split(key)

    params = init_projector_head(k_params, dtype=jnp.bfloat16)
    stacked = stack_projector_params(params)  # one-time prep, reused every call

    # Small synthetic inputs: 64 rows per feature map, channel dims fixed by the module.
    n = 64
    in_dims = [3, 128, 256, 256, 256]
    fkeys = jax.random.split(k_feats, len(in_dims))
    features = [jax.random.normal(fk, (n, d), jnp.float32).astype(jnp.bfloat16)
                for fk, d in zip(fkeys, in_dims)]

    outs = projector_head_forward(features, stacked)
    outs = [jax.block_until_ready(o) for o in outs]

    refs = _reference(features, params)
    for o, r in zip(outs, refs):
        assert o.shape == (n, 256)
        assert jnp.allclose(o.astype(jnp.float32), r.astype(jnp.float32),
                            atol=1e-2, rtol=1e-2)

    print("KERNEL_OK")
</pallas_src>

<mosaic_0001>
module attributes {stable_mosaic.version = 11 : i64} {
  func.func @_mlp_norm_kernel(%arg0: i32, %arg1: i32, %arg2: memref<1x64x256xbf16, #tpu.memory_space<vmem>>, %arg3: memref<1x256x256xbf16, #tpu.memory_space<vmem>>, %arg4: memref<1x1x256xbf16, #tpu.memory_space<vmem>>, %arg5: memref<1x256x256xbf16, #tpu.memory_space<vmem>>, %arg6: memref<1x1x256xbf16, #tpu.memory_space<vmem>>, %arg7: memref<1x64x256xbf16, #tpu.memory_space<vmem>>) attributes {dimension_semantics = [#tpu.dimension_semantics<parallel>, #tpu.dimension_semantics<parallel>], iteration_bounds = array<i64: 5, 1>, scalar_prefetch = 0 : i64, scratch_operands = 0 : i64, tpu.core_type = #tpu.core_type<tc>, window_params = [{transform_indices = @transform_0, window_bounds = array<i64: 1, 64, 256>}, {transform_indices = @transform_1, window_bounds = array<i64: 1, 256, 256>}, {transform_indices = @transform_2, window_bounds = array<i64: 1, 1, 256>}, {transform_indices = @transform_3, window_bounds = array<i64: 1, 256, 256>}, {transform_indices = @transform_4, window_bounds = array<i64: 1, 1, 256>}, {transform_indices = @transform_5, window_bounds = array<i64: 1, 64, 256>}]} {
    %c0 = arith.constant 0 : index
    %c0_0 = arith.constant 0 : index
    %c0_1 = arith.constant 0 : index
    %0 = vector.load %arg2[%c0, %c0_0, %c0_1] : memref<1x64x256xbf16, #tpu.memory_space<vmem>>, vector<1x64x256xbf16>
    %1 = vector.shape_cast %0 : vector<1x64x256xbf16> to vector<64x256xbf16>
    %c0_2 = arith.constant 0 : index
    %c0_3 = arith.constant 0 : index
    %c0_4 = arith.constant 0 : index
    %2 = vector.load %arg3[%c0_2, %c0_3, %c0_4] : memref<1x256x256xbf16, #tpu.memory_space<vmem>>, vector<1x256x256xbf16>
    %3 = vector.shape_cast %2 : vector<1x256x256xbf16> to vector<256x256xbf16>
    %cst = arith.constant dense<0.000000e+00> : vector<64x256xf32>
    %4 = tpu.matmul %1, %3, %cst {dimension_numbers = #tpu.dot_dimension_numbers<[1], [0], [0], [1], [0, 0, 1, 1], [], []>} : vector<64x256xbf16>, vector<256x256xbf16>, vector<64x256xf32> -> vector<64x256xf32>
    %c0_5 = arith.constant 0 : index
    %c0_6 = arith.constant 0 : index
    %c0_7 = arith.constant 0 : index
    %5 = vector.load %arg4[%c0_5, %c0_6, %c0_7] : memref<1x1x256xbf16, #tpu.memory_space<vmem>>, vector<1x1x256xbf16>
    %6 = vector.shape_cast %5 : vector<1x1x256xbf16> to vector<1x256xbf16>
    %7 = arith.extf %6 : vector<1x256xbf16> to vector<1x256xf32>
    %8 = vector.broadcast %7 : vector<1x256xf32> to vector<64x256xf32>
    %9 = arith.addf %4, %8 : vector<64x256xf32>
    %cst_8 = arith.constant 0.000000e+00 : f32
    %10 = vector.broadcast %cst_8 : f32 to vector<64x256xf32>
    %11 = arith.maximumf %9, %10 : vector<64x256xf32>
    %12 = arith.truncf %11 : vector<64x256xf32> to vector<64x256xbf16>
    %c0_9 = arith.constant 0 : index
    %c0_10 = arith.constant 0 : index
    %c0_11 = arith.constant 0 : index
    %13 = vector.load %arg5[%c0_9, %c0_10, %c0_11] : memref<1x256x256xbf16, #tpu.memory_space<vmem>>, vector<1x256x256xbf16>
    %14 = vector.shape_cast %13 : vector<1x256x256xbf16> to vector<256x256xbf16>
    %cst_12 = arith.constant dense<0.000000e+00> : vector<64x256xf32>
    %15 = tpu.matmul %12, %14, %cst_12 {dimension_numbers = #tpu.dot_dimension_numbers<[1], [0], [0], [1], [0, 0, 1, 1], [], []>} : vector<64x256xbf16>, vector<256x256xbf16>, vector<64x256xf32> -> vector<64x256xf32>
    %c0_13 = arith.constant 0 : index
    %c0_14 = arith.constant 0 : index
    %c0_15 = arith.constant 0 : index
    %16 = vector.load %arg6[%c0_13, %c0_14, %c0_15] : memref<1x1x256xbf16, #tpu.memory_space<vmem>>, vector<1x1x256xbf16>
    %17 = vector.shape_cast %16 : vector<1x1x256xbf16> to vector<1x256xbf16>
    %18 = arith.extf %17 : vector<1x256xbf16> to vector<1x256xf32>
    %19 = vector.broadcast %18 : vector<1x256xf32> to vector<64x256xf32>
    %20 = arith.addf %15, %19 : vector<64x256xf32>
    %21 = arith.mulf %20, %20 : vector<64x256xf32>
    %cst_16 = arith.constant dense<0.000000e+00> : vector<64xf32>
    %22 = vector.multi_reduction <add>, %21, %cst_16 [1] : vector<64x256xf32> to vector<64xf32>
    %23 = vector.shape_cast %22 : vector<64xf32> to vector<64x1xf32>
    %24 = math.sqrt %23 : vector<64x1xf32>
    %cst_17 = arith.constant 1.000000e-07 : f32
    %25 = vector.broadcast %cst_17 : f32 to vector<64x1xf32>
    %26 = arith.addf %24, %25 : vector<64x1xf32>
    %27 = tpu.reciprocal %26 {approx = true} : vector<64x1xf32> -> vector<64x1xf32>
    %28 = vector.broadcast %27 : vector<64x1xf32> to vector<64x256xf32>
    %29 = arith.mulf %20, %28 : vector<64x256xf32>
    %30 = arith.truncf %29 : vector<64x256xf32> to vector<64x256xbf16>
    %c0_18 = arith.constant 0 : index
    %c0_19 = arith.constant 0 : index
    %c0_20 = arith.constant 0 : index
    %31 = vector.load %arg7[%c0_18, %c0_19, %c0_20] : memref<1x64x256xbf16, #tpu.memory_space<vmem>>, vector<1x64x256xbf16>
    %32 = vector.shape_cast %31 : vector<1x64x256xbf16> to vector<64x256xbf16>
    %33 = vector.shape_cast %30 : vector<64x256xbf16> to vector<1x64x256xbf16>
    tpu.vector_store %arg7[%c0_18, %c0_19, %c0_20], %33 {strides = array<i32>} : memref<1x64x256xbf16, #tpu.memory_space<vmem>>, vector<1x64x256xbf16>,
    return
  }
  func.func @transform_0(%arg0: i32, %arg1: i32) -> (i32, i32, i32) {
    %c0_i32 = arith.constant 0 : i32
    %c0_i32_0 = arith.constant 0 : i32
    return %arg0, %arg1, %c0_i32 : i32, i32, i32
  }
  func.func @transform_1(%arg0: i32, %arg1: i32) -> (i32, i32, i32) {
    %c0_i32 = arith.constant 0 : i32
    %c0_i32_0 = arith.constant 0 : i32
    %c0_i32_1 = arith.constant 0 : i32
    return %arg0, %c0_i32, %c0_i32_0 : i32, i32, i32
  }
  func.func @transform_2(%arg0: i32, %arg1: i32) -> (i32, i32, i32) {
    %c0_i32 = arith.constant 0 : i32
    %c0_i32_0 = arith.constant 0 : i32
    %c0_i32_1 = arith.constant 0 : i32
    return %arg0, %c0_i32, %c0_i32_0 : i32, i32, i32
  }
  func.func @transform_3(%arg0: i32, %arg1: i32) -> (i32, i32, i32) {
    %c0_i32 = arith.constant 0 : i32
    %c0_i32_0 = arith.constant 0 : i32
    %c0_i32_1 = arith.constant 0 : i32
    return %arg0, %c0_i32, %c0_i32_0 : i32, i32, i32
  }
  func.func @transform_4(%arg0: i32, %arg1: i32) -> (i32, i32, i32) {
    %c0_i32 = arith.constant 0 : i32
    %c0_i32_0 = arith.constant 0 : i32
    %c0_i32_1 = arith.constant 0 : i32
    return %arg0, %c0_i32, %c0_i32_0 : i32, i32, i32
  }
  func.func @transform_5(%arg0: i32, %arg1: i32) -> (i32, i32, i32) {
    %c0_i32 = arith.constant 0 : i32
    %c0_i32_0 = arith.constant 0 : i32
    return %arg0, %arg1, %c0_i32 : i32, i32, i32
  }
}

</mosaic_0001>

<bundles_post_ra>
// kernel: tpu_custom_call.1
= control target key start
LH: loop header
LB: loop body
LE: loop exit
PB: predicated region body
PF: predicated region fallthrough
CT: control target
= control target key end

     0   :  { %s2602_s0 = inlined_call_operand.hbm [shape: bf16[5,64,256], index: 0, kind: input, shape index: {}]   ;;  %s2603_s1 = inlined_call_operand.hbm [shape: bf16[5,256,256], index: 1, kind: input, shape index: {}]   ;;  %s2604_s2 = inlined_call_operand.vmem [shape: bf16[5,1,256], index: 2, kind: input, shape index: {}]   ;;  %s2605_s3 = inlined_call_operand.hbm [shape: bf16[5,256,256], index: 3, kind: input, shape index: {}]   ;;  %s2606_s4 = inlined_call_operand.vmem [shape: bf16[5,1,256], index: 4, kind: input, shape index: {}]   ;;  %s2607_s5 = inlined_call_operand.hbm [shape: bf16[5,64,256], index: 5, kind: output, shape index: {}]  }
   0x1   :  { %2612 = sst [smem:[#allocation17_spill]] %s2603_s1 }
   0x2   :  { %10 = vsyncpa [#allocation3], 0 }
   0x3   :  { %12 = vsyncpa [#allocation3 + $0x1], 0 }
   0x4   :  { %13 = vsyncpa [#allocation6], 0 }
   0x5   :  { %15 = vsyncpa [#allocation6 + $0x1], 0 }
   0x6   :  { %16 = vsyncpa [#allocation4], 0 }
   0x7   :  { %18 = vsyncpa [#allocation4 + $0x1], 0  ;;  %s2153_s18 = smov 0   ;;  %s2155_s19 = smov 0  }
   0x8   :  { %s2157_s20 = smov 0   ;;  %s2159_s21 = smov 0  }
   0x9   :  { %s2161_s22 = smov 0   ;;  %s2163_s23 = smov 0  }
   0xa LB: > { %2613 = sst [smem:[#allocation12_spill]] %s2097_s18  ;;  %s2184_s24 = sadd.s32 4294967295, %s2117_s23   ;;  %s2117_s23 = sphi %s2163_s23, %s24_s23   ;;  %s2113_s22 = sphi %s2161_s22, %s2631_s22   ;;  %s2109_s21 = sphi %s2159_s21, %s2630_s21   ;;  %s2105_s20 = sphi %s2157_s20, %s2626_s20   ;;  %s2101_s19 = sphi %s2155_s19, %s2629_s19   ;;  %s2097_s18 = sphi %s2153_s18, %s2628_s18  }
   0xb   : > { %2614 = sst [smem:[#allocation13_spill]] %s2105_s20  ;;  %s1445_s25 = sadd.s32 4294967294, %s2117_s23  }
   0xc   : > { %s36_s26 = sadd.s32 1, %s2113_s22  ;;  %s45_s27 = sadd.s32 1, %s2105_s20 }
   0xd   : > { %p38_p0 = scmp.ge.s32.totalorder %s36_s26, 5  ;;  %p52_p1 = scmp.ne.s32.totalorder %s2105_s20, %s2101_s19 }
   0xe   : > { %p53_p2 = scmp.eq.s32.totalorder %s2117_s23, 0  ;;  %p58_p3 = scmp.ne.s32.totalorder %s2101_s19, %s2097_s18 }
   0xf   : > { %s2633_s26 = smov (%p38_p0, %s36_s26), 0  ;;  %p59_p5 = scmp.eq.s32.totalorder %s2184_s24, 0 }
  0x10   : > { %2615 = sst [smem:[#allocation14_spill]] %s2633_s26  ;;  %p54_p4 = por %p53_p2, %p52_p1 }
  0x11   : > { %s40_s28 = ssub.s32 %s2113_s22, %s2633_s26  ;;  %p188_p6 = scmp.eq.s32.totalorder %s2184_s24, 4 }
  0x12   : > { %p43_p7 = scmp.eq.s32.totalorder %s40_s28, 0  ;;  %p2200_p8 = por %p59_p5, %p58_p3 }
  0x13   : > { %p2204_p9 = por %p188_p6, %p52_p1  ;;  %p194_p10 = scmp.eq.s32.totalorder %s1445_s25, 4 }
  0x14   : > { %s2209_s6 = scalar_select %p43_p7, %s2105_s20, %s45_s27  }
  0x15   : > { %p2211_p11 = por %p194_p10, %p58_p3  ;;  %p1855_p12 = scmp.lt.s32.totalorder %s2117_s23, 5 }
  0x16   : > { %2618 = sst [smem:[#allocation15_spill]] %s2209_s6  ;;  %s2217_s8 = sand.u32 1, %s2105_s20  }
  0x17   : > { %s2619_s7 = scalar_select %p2211_p11, 1, 0 }
  0x18   : > { %p2219_p13 = pnand %p1855_p12, %p54_p4  ;;  %s239_s10 = sand.u32 1, %s2117_s23  }
  0x19   : > { %2620 = sst [smem:[#allocation16_spill]] %s2619_s7  ;;  %s1451_s11 = sshll.u32 %s2217_s8, 8 }
  0x1a   : > { %s1758_s12 = sshll.u32 %s2113_s22, 8  ;;  %s243_s13 = scalar_lea.vmem [#allocation5], %s1451_s11 }
  0x1b   : > { %s251_s14 = sshll.u32 %s243_s13, 4  ;;  %s2622_s1 = sld [smem:[#allocation17_spill]]  ;;  %s252_s14 = int_to_ptr.vmem [resolvable:$true] %s251_s14 }
  0x1c   : > { %s277_s26 = scalar_lea.hbm %s2605_s3, %s1758_s12  ;;  %s240_s6 = scalar_lea.sflag [#allocation6], %s239_s10 }
  0x1d   : > { %s2119_s20 = smov 128   ;;  %s2120_s7 = smov 8  }
  0x1e   : > { %s278_s13 = sshll.u32 %s277_s26, 4  ;;  %s272_s18 = scalar_lea.vmem [#allocation7], %s1451_s11  ;;  %s279_s13 = int_to_ptr.hbm [resolvable:$true] %s278_s13 }
  0x1f   : > { %s280_s15 = sshll.u32 %s272_s18, 4  ;;  %p1457_p0 = scmp.ge.s32.totalorder %s2117_s23, 1  ;;  %s281_s15 = int_to_ptr.vmem [resolvable:$true] %s280_s15 }
  0x20   : > { %p295_p1 = scmp.lt.s32.totalorder %s2117_s23, 6  ;;  %s1448_s16 = sshll.u32 %s2217_s8, 6 }
  0x21   : > { %s248_s17 = scalar_lea.hbm %s2622_s1, %s1758_s12  ;;  %s218_s1 = scalar_lea.vmem [#allocation2], %s1448_s16 }
  0x22   : > { %s249_s25 = sshll.u32 %s248_s17, 4  ;;  %p296_p2 = pnand %p1457_p0, %p295_p1  ;;  %s250_s25 = int_to_ptr.hbm [resolvable:$true] %s249_s25 }
  0x23   : > { %1847 = dma.hbm_to_vmem [thread:$0]  (!%p2219_p13), %s250_s25, 4096, %s252_s14, %s240_s6, %s2119_s20, %s2119_s20, %s2120_s7  }
  0x24   : > { %s1757_s17 = sshll.u32 %s2113_s22, 6  ;;  %s229_s14 = sshll.u32 %s218_s1, 4  ;;  %s230_s14 = int_to_ptr.vmem [resolvable:$true] %s229_s14 }
  0x25   : > { %s226_s10 = scalar_lea.hbm %s2602_s0, %s1757_s17  ;;  %s215_s26 = scalar_lea.sflag [#allocation3], %s2217_s8 }
  0x26   : > { %s227_s28 = sshll.u32 %s226_s10, 4  ;;  %299 = sbr.rel (%p296_p2) target bundleno = 580 (0x244), region = 40  ;;  %s228_s28 = int_to_ptr.hbm [resolvable:$true] %s227_s28 }
  0x27   : > { %1844 = dma.hbm_to_vmem [thread:$0]  (!%p2219_p13), %s228_s28, 1024, %s230_s14, %s215_s26, %s2119_s20, %s2119_s20, %s2120_s7  }
  0x28   : > { %1850 = dma.hbm_to_vmem [thread:$0]  (!%p2219_p13), %s279_s13, 4096, %s281_s15, %s240_s6, %s2119_s20, %s2119_s20, %s2120_s7  }
  0x29   : > { %s2247_s18 = sand.u32 (!%p296_p2), 1, %s2101_s19  }
  0x2a   : > { %s1458_s11 = sshll.u32 (!%p296_p2), %s2247_s18, 6  ;;  %s302_s25 = scalar_lea.sflag (!%p296_p2), [#allocation3], %s2247_s18 }
  0x2b   : > { %s2253_s16 = scalar_lea.vmem [#allocation2], %s1458_s11 }
  0x2c   : > { %2084 = dma.done.wait (%p2200_p8), %s302_s25, 1024  }
  0x2d   : > { %2086 = vsyncadd (%p2200_p8), %s302_s25, 4294966272  ;;  %s311_s1 = sand.u32 1, %s2184_s24   ;;  %s1459_s20 = sshll.u32 %s2247_s18, 8 }
  0x2e   : > { %s312_s6 = scalar_lea.sflag [#allocation6], %s311_s1  ;;  %s2263_s7 = scalar_lea.vmem [#allocation5], %s1459_s20 }
  0x2f   : > { %2088 = dma.done.wait (%p2200_p8), %s312_s6, 8192  }
  0x30   : > { %2090 = vsyncadd (%p2200_p8), %s312_s6, 4294959104  ;;  %v1554_v0 = vld [vmem:[%s2263_s7 + $0x70] sm:$0xf]  ;;  %v1783_v1 = vld [vmem:[%s2263_s7 + $0x74] sm:$0xf0]  ;;  %s2343_s24 = scalar_lea.vmem [#allocation7], %s1459_s20 }
  0x31   : > { %v1618_v2 = vld [vmem:[%s2263_s7 + $0xf0] sm:$0xf]  ;;  %v1555_v3 = vor.u32 %v1783_v1, %v1554_v0  ;;  %v1799_v4 = vld [vmem:[%s2263_s7 + $0xf4] sm:$0xf0]  ;;  %v1782_v5 = vld [vmem:[%s2263_s7 + $0x74] sm:$0xf] }
  0x32   : > { %v1556_v6 = vld [vmem:[%s2263_s7 + $0x78] sm:$0xf0]  ;;  %v1619_v7 = vor.u32 %v1799_v4, %v1618_v2  ;;  %v1798_v9 = vld [vmem:[%s2263_s7 + $0xf4] sm:$0xf]  ;;  %v1546_v11 = vld [vmem:[%s2263_s7 + $0x60] sm:$0xf] }
  0x33   : > { %v1559_v8 = vor.u32 %v1782_v5, %v1556_v6  ;;  %v1620_v10 = vld [vmem:[%s2263_s7 + $0xf8] sm:$0xf0]  ;;  %630 = vmatpush.bf16.msra.mxu0 %v1555_v3  ;;  %v1781_v13 = vld [vmem:[%s2263_s7 + $0x64] sm:$0xf0]  ;;  %v1610_v14 = vld [vmem:[%s2263_s7 + $0xe0] sm:$0xf] }
  0x34   : > { %v1623_v12 = vor.u32 %v1798_v9, %v1620_v10  ;;  %v1797_v15 = vld [vmem:[%s2263_s7 + $0xe4] sm:$0xf0]  ;;  %659 = vmatpush.bf16.msra.mxu1 %v1619_v7  ;;  %v1547_v16 = vor.u32 %v1781_v13, %v1546_v11  ;;  %v1780_v18 = vld [vmem:[%s2263_s7 + $0x64] sm:$0xf]  ;;  %v1548_v19 = vld [vmem:[%s2263_s7 + $0x68] sm:$0xf0] }
  0x35   : > { %688 = vmatpush.bf16.msra.mxu2 %v1559_v8  ;;  %v1611_v17 = vor.u32 %v1797_v15, %v1610_v14  ;;  %v1796_v20 = vld [vmem:[%s2263_s7 + $0xe4] sm:$0xf]  ;;  %v1551_v21 = vor.u32 %v1780_v18, %v1548_v19  ;;  %v1612_v22 = vld [vmem:[%s2263_s7 + $0xe8] sm:$0xf0]  ;;  %v1538_v23 = vld [vmem:[%s2263_s7 + $0x50] sm:$0xf] }
  0x36   : > { %717 = vmatpush.bf16.msra.mxu3 %v1623_v12  ;;  %v1779_v24 = vld [vmem:[%s2263_s7 + $0x54] sm:$0xf0]  ;;  %v1615_v25 = vor.u32 %v1796_v20, %v1612_v22  ;;  %v1602_v26 = vld [vmem:[%s2263_s7 + $0xd0] sm:$0xf]  ;;  %v1778_v28 = vld [vmem:[%s2263_s7 + $0x54] sm:$0xf] }
  0x37   : > { %v1795_v27 = vld [vmem:[%s2263_s7 + $0xd4] sm:$0xf0]  ;;  %631 = vmatpush.bf16.msra.mxu0 %v1547_v16  ;;  %v1539_v29 = vor.u32 %v1779_v24, %v1538_v23  ;;  %v1540_v30 = vld [vmem:[%s2263_s7 + $0x58] sm:$0xf0]  ;;  %v1794_v31 = vld [vmem:[%s2263_s7 + $0xd4] sm:$0xf] }
  0x38   : > { %v1604_v32 = vld [vmem:[%s2263_s7 + $0xd8] sm:$0xf0]  ;;  %660 = vmatpush.bf16.msra.mxu1 %v1611_v17  ;;  %v1603_v33 = vor.u32 %v1795_v27, %v1602_v26  ;;  %v1543_v34 = vor.u32 %v1778_v28, %v1540_v30  ;;  %v1530_v35 = vld [vmem:[%s2263_s7 + $0x40] sm:$0xf]  ;;  %v1777_v36 = vld [vmem:[%s2263_s7 + $0x44] sm:$0xf0] }
  0x39   : > { %689 = vmatpush.bf16.msra.mxu2 %v1551_v21  ;;  %v1594_v37 = vld [vmem:[%s2263_s7 + $0xc0] sm:$0xf]  ;;  %v1607_v38 = vor.u32 %v1794_v31, %v1604_v32  ;;  %v1793_v39 = vld [vmem:[%s2263_s7 + $0xc4] sm:$0xf0]  ;;  %v1776_v40 = vld [vmem:[%s2263_s7 + $0x44] sm:$0xf]  ;;  %v1531_v44 = vor.u32 %v1777_v36, %v1530_v35 }
  0x3a   : > { %718 = vmatpush.bf16.msra.mxu3 %v1615_v25  ;;  %v1532_v41 = vld [vmem:[%s2263_s7 + $0x48] sm:$0xf0]  ;;  %v1792_v42 = vld [vmem:[%s2263_s7 + $0xc4] sm:$0xf]  ;;  %v1595_v45 = vor.u32 %v1793_v39, %v1594_v37  ;;  %v1522_v47 = vld [vmem:[%s2263_s7 + $0x30] sm:$0xf] }
  0x3b   : > { %v1596_v43 = vld [vmem:[%s2263_s7 + $0xc8] sm:$0xf0]  ;;  %632 = vmatpush.bf16.msra.mxu0 %v1539_v29  ;;  %v1535_v46 = vor.u32 %v1776_v40, %v1532_v41  ;;  %v1775_v48 = vld [vmem:[%s2263_s7 + $0x34] sm:$0xf0]  ;;  %v1586_v49 = vld [vmem:[%s2263_s7 + $0xb0] sm:$0xf] }
  0x3c   : > { %661 = vmatpush.bf16.msra.mxu1 %v1603_v33  ;;  %v1599_v50 = vor.u32 %v1792_v42, %v1596_v43  ;;  %v1791_v51 = vld [vmem:[%s2263_s7 + $0xb4] sm:$0xf0]  ;;  %v1774_v52 = vld [vmem:[%s2263_s7 + $0x34] sm:$0xf]  ;;  %v1524_v53 = vld [vmem:[%s2263_s7 + $0x38] sm:$0xf0]  ;;  %v1523_v56 = vor.u32 %v1775_v48, %v1522_v47 }
  0x3d   : > { %690 = vmatpush.bf16.msra.mxu2 %v1543_v34  ;;  %v1790_v54 = vld [vmem:[%s2263_s7 + $0xb4] sm:$0xf]  ;;  %v1588_v55 = vld [vmem:[%s2263_s7 + $0xb8] sm:$0xf0]  ;;  %v1587_v57 = vor.u32 %v1791_v51, %v1586_v49  ;;  %v1527_v58 = vor.u32 %v1774_v52, %v1524_v53  ;;  %v1514_v59 = vld [vmem:[%s2263_s7 + $0x20] sm:$0xf] }
  0x3e   : > { %719 = vmatpush.bf16.msra.mxu3 %v1607_v38  ;;  %v1773_v60 = vld [vmem:[%s2263_s7 + $0x24] sm:$0xf0]  ;;  %v1578_v61 = vld [vmem:[%s2263_s7 + $0xa0] sm:$0xf]  ;;  %v1591_v62 = vor.u32 %v1790_v54, %v1588_v55  ;;  %v1772_v0 = vld [vmem:[%s2263_s7 + $0x24] sm:$0xf] }
  0x3f   : > { %633 = vmatpush.bf16.msra.mxu0 %v1531_v44  ;;  %v1789_v63 = vld [vmem:[%s2263_s7 + $0xa4] sm:$0xf0]  ;;  %v1516_v1 = vld [vmem:[%s2263_s7 + $0x28] sm:$0xf0]  ;;  %v1788_v2 = vld [vmem:[%s2263_s7 + $0xa4] sm:$0xf]  ;;  %v1515_v4 = vor.u32 %v1773_v60, %v1514_v59 }
  0x40   : > { %662 = vmatpush.bf16.msra.mxu1 %v1595_v45  ;;  %v1580_v3 = vld [vmem:[%s2263_s7 + $0xa8] sm:$0xf0]  ;;  %v1579_v5 = vor.u32 %v1789_v63, %v1578_v61  ;;  %v1519_v6 = vor.u32 %v1772_v0, %v1516_v1  ;;  %v1506_v7 = vld [vmem:[%s2263_s7 + $0x10] sm:$0xf]  ;;  %v1771_v8 = vld [vmem:[%s2263_s7 + $0x14] sm:$0xf0] }
  0x41   : > { %691 = vmatpush.bf16.msra.mxu2 %v1535_v46  ;;  %v1570_v9 = vld [vmem:[%s2263_s7 + $0x90] sm:$0xf]  ;;  %v1583_v10 = vor.u32 %v1788_v2, %v1580_v3  ;;  %v1787_v11 = vld [vmem:[%s2263_s7 + $0x94] sm:$0xf0]  ;;  %v1770_v12 = vld [vmem:[%s2263_s7 + $0x14] sm:$0xf]  ;;  %v1507_v16 = vor.u32 %v1771_v8, %v1506_v7 }
  0x42   : > { %720 = vmatpush.bf16.msra.mxu3 %v1599_v50  ;;  %v1508_v13 = vld [vmem:[%s2263_s7 + $0x18] sm:$0xf0]  ;;  %v1786_v14 = vld [vmem:[%s2263_s7 + $0x94] sm:$0xf]  ;;  %v1571_v17 = vor.u32 %v1787_v11, %v1570_v9  ;;  %v1498_v19 = vld [vmem:[%s2263_s7] sm:$0xf] }
  0x43   : > { %634 = vmatpush.bf16.msra.mxu0 %v1523_v56  ;;  %v1572_v15 = vld [vmem:[%s2263_s7 + $0x98] sm:$0xf0]  ;;  %v1511_v18 = vor.u32 %v1770_v12, %v1508_v13  ;;  %v1769_v20 = vld [vmem:[%s2263_s7 + $0x4] sm:$0xf0]  ;;  %v1562_v21 = vld [vmem:[%s2263_s7 + $0x80] sm:$0xf] }
  0x44   : > { %663 = vmatpush.bf16.msra.mxu1 %v1587_v57  ;;  %v1575_v22 = vor.u32 %v1786_v14, %v1572_v15  ;;  %v1785_v23 = vld [vmem:[%s2263_s7 + $0x84] sm:$0xf0]  ;;  %v1768_v24 = vld [vmem:[%s2263_s7 + $0x4] sm:$0xf]  ;;  %v1500_v25 = vld [vmem:[%s2263_s7 + $0x8] sm:$0xf0]  ;;  %v1499_v28 = vor.u32 %v1769_v20, %v1498_v19 }
  0x45   : > { %692 = vmatpush.bf16.msra.mxu2 %v1527_v58  ;;  %v1784_v26 = vld [vmem:[%s2263_s7 + $0x84] sm:$0xf]  ;;  %v1564_v27 = vld [vmem:[%s2263_s7 + $0x88] sm:$0xf0]  ;;  %v1466_v29 = vld [vmem:[%s2253_s16] sm:$0xf]  ;;  %v1563_v31 = vor.u32 %v1785_v23, %v1562_v21  ;;  %v1503_v32 = vor.u32 %v1768_v24, %v1500_v25 }
  0x46   : > { %721 = vmatpush.bf16.msra.mxu3 %v1591_v62  ;;  %v1761_v30 = vld [vmem:[%s2253_s16 + $0x4] sm:$0xf0]  ;;  %v1760_v33 = vld [vmem:[%s2253_s16 + $0x4] sm:$0xf]  ;;  %v1468_v34 = vld [vmem:[%s2253_s16 + $0x8] sm:$0xf0]  ;;  %v1567_v35 = vor.u32 %v1784_v26, %v1564_v27 }
  0x47   : > { %635 = vmatpush.bf16.msra.mxu0 %v1515_v4  ;;  %v1467_v36 = vor.u32 %v1761_v30, %v1466_v29  ;;  %v1471_v37 = vor.u32 %v1760_v33, %v1468_v34  ;;  %v1474_v38 = vld [vmem:[%s2253_s16 + $0x10] sm:$0xf]  ;;  %v1763_v39 = vld [vmem:[%s2253_s16 + $0x14] sm:$0xf0]  ;;  %v1762_v40 = vld [vmem:[%s2253_s16 + $0x14] sm:$0xf] }
  0x48   : > { %664 = vmatpush.bf16.msra.mxu1 %v1579_v5  ;;  %v1476_v41 = vld [vmem:[%s2253_s16 + $0x18] sm:$0xf0]  ;;  %v1475_v42 = vor.u32 %v1763_v39, %v1474_v38  ;;  %v1814_v44 = vld [vmem:[%s2343_s24 + $0x74] sm:$0xf]  ;;  %v1682_v49 = vld [vmem:[%s2343_s24 + $0x70] sm:$0xf] }
  0x49   : > { %693 = vmatpush.bf16.msra.mxu2 %v1519_v6  ;;  %v1479_v43 = vor.u32 %v1762_v40, %v1476_v41  ;;  %v1684_v45 = vld [vmem:[%s2343_s24 + $0x78] sm:$0xf0]  ;;  %v1830_v46 = vld [vmem:[%s2343_s24 + $0xf4] sm:$0xf]  ;;  %v1815_v50 = vld [vmem:[%s2343_s24 + $0x74] sm:$0xf0] }
  0x4a   : > { %722 = vmatpush.bf16.msra.mxu3 %v1583_v10  ;;  %v1687_v47 = vor.u32 %v1814_v44, %v1684_v45  ;;  %v1748_v48 = vld [vmem:[%s2343_s24 + $0xf8] sm:$0xf0]  ;;  %v1683_v52 = vor.u32 %v1815_v50, %v1682_v49  ;;  %v1746_v53 = vld [vmem:[%s2343_s24 + $0xf0] sm:$0xf]  ;;  %v1831_v54 = vld [vmem:[%s2343_s24 + $0xf4] sm:$0xf0] }
  0x4b   : > { %636 = vmatpush.bf16.msra.mxu0 %v1507_v16  ;;  %v1751_v51 = vor.u32 %v1830_v46, %v1748_v48  ;;  %v1812_v55 = vld [vmem:[%s2343_s24 + $0x64] sm:$0xf]  ;;  %v1747_v56 = vor.u32 %v1831_v54, %v1746_v53  ;;  %v1676_v57 = vld [vmem:[%s2343_s24 + $0x68] sm:$0xf0]  ;;  %v1674_v62 = vld [vmem:[%s2343_s24 + $0x60] sm:$0xf] }
  0x4c   : > { %665 = vmatpush.bf16.msra.mxu1 %v1571_v17  ;;  %v1828_v58 = vld [vmem:[%s2343_s24 + $0xe4] sm:$0xf]  ;;  %v1740_v59 = vld [vmem:[%s2343_s24 + $0xe8] sm:$0xf0]  ;;  %v1679_v60 = vor.u32 %v1812_v55, %v1676_v57  ;;  %v1813_v63 = vld [vmem:[%s2343_s24 + $0x64] sm:$0xf0] }
  0x4d   : > { %694 = vmatpush.bf16.msra.mxu2 %v1511_v18  ;;  %v1743_v61 = vor.u32 %v1828_v58, %v1740_v59  ;;  %v1738_v0 = vld [vmem:[%s2343_s24 + $0xe0] sm:$0xf]  ;;  %v1765_v2 = vld [vmem:[%s2253_s16 + $0x24] sm:$0xf0]  ;;  %v1675_v3 = vor.u32 %v1813_v63, %v1674_v62  ;;  %v1810_v5 = vld [vmem:[%s2343_s24 + $0x54] sm:$0xf] }
  0x4e   : > { %723 = vmatpush.bf16.msra.mxu3 %v1575_v22  ;;  %v1482_v1 = vld [vmem:[%s2253_s16 + $0x20] sm:$0xf]  ;;  %v1829_v4 = vld [vmem:[%s2343_s24 + $0xe4] sm:$0xf0]  ;;  %v1668_v6 = vld [vmem:[%s2343_s24 + $0x58] sm:$0xf0] }
  0x4f   : > { %637 = vmatpush.bf16.msra.mxu0 %v1499_v28  ;;  %v1739_v7 = vor.u32 %v1829_v4, %v1738_v0  ;;  %v1826_v8 = vld [vmem:[%s2343_s24 + $0xd4] sm:$0xf]  ;;  %v1732_v9 = vld [vmem:[%s2343_s24 + $0xd8] sm:$0xf0]  ;;  %v1666_v10 = vld [vmem:[%s2343_s24 + $0x50] sm:$0xf]  ;;  %v1671_v11 = vor.u32 %v1810_v5, %v1668_v6  ;;  %v1483_v23 = vor.u32 %v1765_v2, %v1482_v1 }
  0x50   : > { %666 = vmatpush.bf16.msra.mxu1 %v1563_v31  ;;  %v1811_v12 = vld [vmem:[%s2343_s24 + $0x54] sm:$0xf0]  ;;  %v1730_v13 = vld [vmem:[%s2343_s24 + $0xd0] sm:$0xf]  ;;  %v1764_v15 = vld [vmem:[%s2253_s16 + $0x24] sm:$0xf]  ;;  %v1735_v17 = vor.u32 %v1826_v8, %v1732_v9 }
  0x51   : > { %695 = vmatpush.bf16.msra.mxu2 %v1503_v32  ;;  %v1827_v14 = vld [vmem:[%s2343_s24 + $0xd4] sm:$0xf0]  ;;  %v1484_v16 = vld [vmem:[%s2253_s16 + $0x28] sm:$0xf0]  ;;  %v1667_v18 = vor.u32 %v1811_v12, %v1666_v10  ;;  %v1808_v20 = vld [vmem:[%s2343_s24 + $0x44] sm:$0xf] }
  0x52   : > { %724 = vmatpush.bf16.msra.mxu3 %v1567_v35  ;;  %638 = vmatmul.bf16.vlgmr.msra.gmra.mxu0 %v1467_v36  ;;  %v1731_v19 = vor.u32 %v1827_v14, %v1730_v13  ;;  %v1660_v21 = vld [vmem:[%s2343_s24 + $0x48] sm:$0xf0]  ;;  %v1824_v22 = vld [vmem:[%s2343_s24 + $0xc4] sm:$0xf]  ;;  %v1658_v25 = vld [vmem:[%s2343_s24 + $0x40] sm:$0xf]  ;;  %v1487_v27 = vor.u32 %v1764_v15, %v1484_v16 }
  0x53   : > { %667 = vmatmul.bf16.vlgmr.msra.gmra.mxu1 %v1471_v37  ;;  %971 = vmatpush.bf16.msrb.mxu0 %v1683_v52  ;;  %v1724_v24 = vld [vmem:[%s2343_s24 + $0xc8] sm:$0xf0]  ;;  %v1809_v26 = vld [vmem:[%s2343_s24 + $0x44] sm:$0xf0]  ;;  %v1722_v28 = vld [vmem:[%s2343_s24 + $0xc0] sm:$0xf]  ;;  %v1663_v30 = vor.u32 %v1808_v20, %v1660_v21 }
  0x54   : > { %696 = vmatmul.bf16.vlgmr.msra.gmra.mxu2 %v1467_v36  ;;  %1000 = vmatpush.bf16.msrb.mxu1 %v1747_v56  ;;  %v1825_v29 = vld [vmem:[%s2343_s24 + $0xc4] sm:$0xf0]  ;;  %v1727_v31 = vor.u32 %v1824_v22, %v1724_v24  ;;  %v1659_v32 = vor.u32 %v1809_v26, %v1658_v25  ;;  %v1806_v33 = vld [vmem:[%s2343_s24 + $0x34] sm:$0xf]  ;;  %v1652_v34 = vld [vmem:[%s2343_s24 + $0x38] sm:$0xf0] }
  0x55   : > { %725 = vmatmul.bf16.vlgmr.msra.gmra.mxu3 %v1471_v37  ;;  %1029 = vmatpush.bf16.msrb.mxu2 %v1687_v47  ;;  %v1822_v35 = vld [vmem:[%s2343_s24 + $0xb4] sm:$0xf]  ;;  %v1723_v36 = vor.u32 %v1825_v29, %v1722_v28  ;;  %v1716_v37 = vld [vmem:[%s2343_s24 + $0xb8] sm:$0xf0]  ;;  %v1650_v38 = vld [vmem:[%s2343_s24 + $0x30] sm:$0xf] }
  0x56   : > { %1058 = vmatpush.bf16.msrb.mxu3 %v1751_v51  ;;  %v1807_v39 = vld [vmem:[%s2343_s24 + $0x34] sm:$0xf0]  ;;  %v1714_v40 = vld [vmem:[%s2343_s24 + $0xb0] sm:$0xf]  ;;  %v1804_v45 = vld [vmem:[%s2343_s24 + $0x24] sm:$0xf] }
  0x57   : > { %972 = vmatpush.bf16.msrb.mxu0 %v1675_v3  ;;  %v1823_v41 = vld [vmem:[%s2343_s24 + $0xb4] sm:$0xf0]  ;;  %v1651_v44 = vor.u32 %v1807_v39, %v1650_v38  ;;  %v1644_v46 = vld [vmem:[%s2343_s24 + $0x28] sm:$0xf0]  ;;  %v1820_v48 = vld [vmem:[%s2343_s24 + $0xa4] sm:$0xf] }
  0x58   : > { %1001 = vmatpush.bf16.msrb.mxu1 %v1739_v7  ;;  %v1715_v47 = vor.u32 %v1823_v41, %v1714_v40  ;;  %v1708_v49 = vld [vmem:[%s2343_s24 + $0xa8] sm:$0xf0]  ;;  %v1647_v50 = vor.u32 %v1804_v45, %v1644_v46  ;;  %v1490_v52 = vld [vmem:[%s2253_s16 + $0x30] sm:$0xf]  ;;  %v1767_v53 = vld [vmem:[%s2253_s16 + $0x34] sm:$0xf0] }
  0x59   : > { %1030 = vmatpush.bf16.msrb.mxu2 %v1679_v60  ;;  %v1711_v51 = vor.u32 %v1820_v48, %v1708_v49  ;;  %v1766_v54 = vld [vmem:[%s2253_s16 + $0x34] sm:$0xf]  ;;  %v1492_v55 = vld [vmem:[%s2253_s16 + $0x38] sm:$0xf0]  ;;  %v1491_v56 = vor.u32 %v1767_v53, %v1490_v52  ;;  %v1642_v58 = vld [vmem:[%s2343_s24 + $0x20] sm:$0xf] }
  0x5a   : > { %1059 = vmatpush.bf16.msrb.mxu3 %v1743_v61  ;;  %v1495_v57 = vor.u32 %v1766_v54, %v1492_v55  ;;  %v1805_v59 = vld [vmem:[%s2343_s24 + $0x24] sm:$0xf0]  ;;  %v1706_v60 = vld [vmem:[%s2343_s24 + $0xa0] sm:$0xf]  ;;  %v1802_v63 = vld [vmem:[%s2343_s24 + $0x14] sm:$0xf] }
  0x5b   : > { %973 = vmatpush.bf16.msrb.mxu0 %v1667_v18  ;;  %v1643_v61 = vor.u32 %v1805_v59, %v1642_v58  ;;  %v1821_v62 = vld [vmem:[%s2343_s24 + $0xa4] sm:$0xf0]  ;;  %v1636_v0 = vld [vmem:[%s2343_s24 + $0x18] sm:$0xf0]  ;;  %p372_p3 = scmp.lt.s32.totalorder %s2109_s21, 4  ;;  %s2540_s10 = scalar_lea.vmem [#allocation8], %s1458_s11 }
  0x5c   : > { %1002 = vmatpush.bf16.msrb.mxu1 %v1731_v19  ;;  %v1707_v1 = vor.u32 %v1821_v62, %v1706_v60  ;;  %v1639_v2 = vor.u32 %v1802_v63, %v1636_v0  ;;  %v1634_v3 = vld [vmem:[%s2343_s24 + $0x10] sm:$0xf]  ;;  %v1803_v4 = vld [vmem:[%s2343_s24 + $0x14] sm:$0xf0]  ;;  %v1818_v6 = vld [vmem:[%s2343_s24 + $0x94] sm:$0xf] }
  0x5d   : > { %1031 = vmatpush.bf16.msrb.mxu2 %v1671_v11  ;;  %v1635_v5 = vor.u32 %v1803_v4, %v1634_v3  ;;  %s2407_s29 = scalar_select %p372_p3, %s2109_s21, 4  ;;  %v1700_v7 = vld [vmem:[%s2343_s24 + $0x98] sm:$0xf0]  ;;  %v1800_v9 = vld [vmem:[%s2343_s24 + $0x4] sm:$0xf] }
  0x5e   : > { %1060 = vmatpush.bf16.msrb.mxu3 %v1735_v17  ;;  %v1703_v8 = vor.u32 %v1818_v6, %v1700_v7  ;;  %v1628_v10 = vld [vmem:[%s2343_s24 + $0x8] sm:$0xf0]  ;;  %v1626_v11 = vld [vmem:[%s2343_s24] sm:$0xf]  ;;  %v1801_v13 = vld [vmem:[%s2343_s24 + $0x4] sm:$0xf0] }
  0x5f   : > { %974 = vmatpush.bf16.msrb.mxu0 %v1659_v32  ;;  %v1631_v12 = vor.u32 %v1800_v9, %v1628_v10  ;;  %v1698_v14 = vld [vmem:[%s2343_s24 + $0x90] sm:$0xf]  ;;  %v1819_v15 = vld [vmem:[%s2343_s24 + $0x94] sm:$0xf0]  ;;  %v1627_v16 = vor.u32 %v1801_v13, %v1626_v11  ;;  %s1462_s8 = sshll.u32 %s2407_s29, 1  ;;  %s1832_s28 = sshll.u32 %s2109_s21, 6 }
  0x60   : > { %1003 = vmatpush.bf16.msrb.mxu1 %v1723_v36  ;;  %v1699_v17 = vor.u32 %v1819_v15, %v1698_v14  ;;  %s375_s15 = scalar_lea.vmem %s2604_s2, %s1462_s8  ;;  %v1816_v18 = vld [vmem:[%s2343_s24 + $0x84] sm:$0xf]  ;;  %v1692_v19 = vld [vmem:[%s2343_s24 + $0x88] sm:$0xf0]  ;;  %v1690_v20 = vld [vmem:[%s2343_s24 + $0x80] sm:$0xf]  ;;  %s379_s12 = scalar_lea.vmem %s2606_s4, %s1462_s8 }
  0x61   : > { %1032 = vmatpush.bf16.msrb.mxu2 %v1663_v30  ;;  %v1695_v21 = vor.u32 %v1816_v18, %v1692_v19  ;;  %v1817_v22 = vld [vmem:[%s2343_s24 + $0x84] sm:$0xf0]  ;;  %v421_v24 = vld [vmem:[%s375_s15] sm:$0x3]  ;;  %s1286_s11 = scalar_lea.hbm %s2607_s5, %s1832_s28  ;;  %s1287_s25 = sshll.u32 %s2540_s10, 4  ;;  %s1288_s25 = int_to_ptr.vmem [resolvable:$true] %s1287_s25 }
  0x62   : > { %643 = vmatmul.bf16.gmra.mxu0 %v1475_v42  ;;  %1061 = vmatpush.bf16.msrb.mxu3 %v1727_v31  ;;  %v422_v25 = vunpack.c.l.bf16 %v421_v24  ;;  %s1289_s16 = sshll.u32 %s1286_s11, 4  ;;  %s1272_s21 = scalar_lea.sflag [#allocation4], %s2247_s18  ;;  %s1290_s16 = int_to_ptr.hbm [resolvable:$true] %s1289_s16 }
  0x63   : > { %672 = vmatmul.bf16.gmra.mxu1 %v1479_v43  ;;  %975 = vmatpush.bf16.msrb.mxu0 %v1651_v44  ;;  %s2045_s1 = sshra.s32 %s1290_s16, 4  ;;  %s2051_s24 = scalar_lea.hbm %s2607_s5, 320  ;;  %s2046_s1 = int_to_ptr.hbm [resolvable:$true] %s2045_s1 }
  0x64   : > { %701 = vmatmul.bf16.gmra.mxu2 %v1475_v42  ;;  %v1655_v42 = vor.u32 %v1806_v33, %v1652_v34  ;;  %1004 = vmatpush.bf16.msrb.mxu1 %v1715_v47  ;;  %v424_v26 = vperm.slane %v422_v25, 0  ;;  %v425_v30 = vperm.slane %v422_v25, 2  ;;  %s2047_s20 = scalar_lea.hbm %s2046_s1, 64  ;;  %p2052_p7 = scmp.lt.s32.totalorder %s2046_s1, %s2607_s5 }
  0x65   : > { %730 = vmatmul.bf16.gmra.mxu3 %v1479_v43  ;;  %v1719_v43 = vor.u32 %v1822_v35, %v1716_v37  ;;  %p2048_p4 = scmp.ne.s32.totalorder %s2046_s1, %s2047_s20  ;;  %p2053_p8 = scmp.lt.s32.totalorder %s2051_s24, %s2047_s20 }
  0x66   : > { %1033 = vmatpush.bf16.msrb.mxu2 %v1655_v42  ;;  %v2427_v28 = vperm.slane %v424_v26, 0  ;;  %v2430_v33 = vperm.slane %v425_v30, 0 }
  0x67   : > { %1062 = vmatpush.bf16.msrb.mxu3 %v1719_v43  ;;  %976 = vmatpush.bf16.msrb.mxu0 %v1643_v61  ;;  %p2049_p5 = pnand %p2048_p4, %p2204_p9  ;;  %p2054_p10 = por %p2053_p8, %p2052_p7 }
  0x68   : > { %1005 = vmatpush.bf16.msrb.mxu1 %v1707_v1 }
  0x69   : > { %p2050_p6 = pneg %p2049_p5 }
  0x6a   : > { %1034 = vmatpush.bf16.msrb.mxu2 %v1647_v50 }
  0x6b   : > { %1063 = vmatpush.bf16.msrb.mxu3 %v1711_v51  ;;  %977 = vmatpush.bf16.msrb.mxu0 %v1635_v5  ;;  %p2055_p12 = pnand %p2054_p10, %p2050_p6 }
  0x6c   : > { %1006 = vmatpush.bf16.msrb.mxu1 %v1699_v17 }
  0x6e   : > { %1035 = vmatpush.bf16.msrb.mxu2 %v1639_v2 }
  0x6f   : > { %1064 = vmatpush.bf16.msrb.mxu3 %v1703_v8  ;;  %978 = vmatpush.bf16.msrb.mxu0 %v1627_v16 }
  0x72   : > { %648 = vmatmul.bf16.gmra.mxu0 %v1483_v23  ;;  %1036 = vmatpush.bf16.msrb.mxu2 %v1631_v12 }
  0x73   : > { %677 = vmatmul.bf16.gmra.mxu1 %v1487_v27  ;;  %1065 = vmatpush.bf16.msrb.mxu3 %v1695_v21 }
  0x74   : > { %706 = vmatmul.bf16.gmra.mxu2 %v1483_v23  ;;  %v1691_v23 = vor.u32 %v1817_v22, %v1690_v20 }
  0x75   : > { %735 = vmatmul.bf16.gmra.mxu3 %v1487_v27 }
  0x76   : > { %1007 = vmatpush.bf16.msrb.mxu1 %v1691_v23 }
  0x82   : > { %653 = vmatmul.bf16.gmra.mxu0 %v1491_v56 }
  0x83   : > { %682 = vmatmul.bf16.gmra.mxu1 %v1495_v57 }
  0x84   : > { %711 = vmatmul.bf16.gmra.mxu2 %v1491_v56 }
  0x85   : > { %740 = vmatmul.bf16.gmra.mxu3 %v1495_v57 }
  0xcf   : > { %v639_v27 = vpop.f32.mrf.mxu0 }
  0xd0   : > { %v668_v29 = vpop.f32.mrf.mxu1  ;;  %v640_v31 = vadd.f32 %v639_v27, %v2427_v28 }
  0xd2   : > { %v669_v36 = vadd.f32 %v668_v29, %v640_v31 }
  0xd4   : > { %v746_v41 = vmax.f32 %v669_v36, 0.0 }
  0xd7   : > { %v697_v32 = vpop.f32.mrf.mxu2  ;;  %v641_v35 = vpop.f32.mrf.mxu0 }
  0xd8   : > { %v726_v34 = vpop.f32.mrf.mxu3  ;;  %v642_v37 = vadd.f32 %v641_v35, %v2427_v28  ;;  %v670_v38 = vpop.f32.mrf.mxu1  ;;  %v698_v40 = vadd.f32 %v697_v32, %v2430_v33 }
  0xda   : > { %v671_v39 = vadd.f32 %v670_v38, %v642_v37  ;;  %v727_v45 = vadd.f32 %v726_v34, %v698_v40 }
  0xdc   : > { %v748_v42 = vmax.f32 %v671_v39, 0.0  ;;  %v747_v51 = vmax.f32 %v727_v45, 0.0 }
  0xde   : > { %v762_v43 = vpack.c.bf16 %v748_v42, %v746_v41 }
  0xdf   : > { %v699_v44 = vpop.f32.mrf.mxu2  ;;  %v644_v48 = vpop.f32.mrf.mxu0 }
  0xe0   : > { %v700_v46 = vadd.f32 %v699_v44, %v2430_v33  ;;  %v728_v47 = vpop.f32.mrf.mxu3  ;;  %v673_v49 = vpop.f32.mrf.mxu1  ;;  %979 = vmatmul.bf16.vlgmr.msrb.gmra.mxu0 %v762_v43  ;;  %1037 = vmatmul.bf16.vlgmr.msrb.gmra.mxu2 %v762_v43  ;;  %v645_v53 = vadd.f32 %v644_v48, %v2427_v28 }
  0xe2   : > { %v729_v50 = vadd.f32 %v728_v47, %v700_v46  ;;  %v674_v58 = vadd.f32 %v673_v49, %v645_v53 }
  0xe4   : > { %v749_v52 = vmax.f32 %v729_v50, 0.0  ;;  %v750_v63 = vmax.f32 %v674_v58, 0.0 }
  0xe6   : > { %v763_v54 = vpack.c.bf16 %v749_v52, %v747_v51 }
  0xe7   : > { %v702_v55 = vpop.f32.mrf.mxu2  ;;  %v646_v57 = vpop.f32.mrf.mxu0 }
  0xe8   : > { %v731_v56 = vpop.f32.mrf.mxu3  ;;  %1008 = vmatmul.bf16.vlgmr.msrb.gmra.mxu1 %v763_v54  ;;  %1066 = vmatmul.bf16.vlgmr.msrb.gmra.mxu3 %v763_v54  ;;  %v647_v59 = vadd.f32 %v646_v57, %v2427_v28  ;;  %v675_v60 = vpop.f32.mrf.mxu1  ;;  %v703_v62 = vadd.f32 %v702_v55, %v2430_v33 }
  0xea   : > { %v676_v61 = vadd.f32 %v675_v60, %v647_v59  ;;  %v732_v3 = vadd.f32 %v731_v56, %v703_v62 }
  0xec   : > { %v752_v0 = vmax.f32 %v676_v61, 0.0  ;;  %v751_v9 = vmax.f32 %v732_v3, 0.0 }
  0xee   : > { %v764_v2 = vpack.c.bf16 %v752_v0, %v750_v63 }
  0xef   : > { %v704_v1 = vpop.f32.mrf.mxu2  ;;  %v649_v6 = vpop.f32.mrf.mxu0 }
  0xf0   : > { %v705_v4 = vadd.f32 %v704_v1, %v2430_v33  ;;  %v733_v5 = vpop.f32.mrf.mxu3  ;;  %v678_v7 = vpop.f32.mrf.mxu1  ;;  %984 = vmatmul.bf16.gmra.mxu0 %v764_v2  ;;  %1042 = vmatmul.bf16.gmra.mxu2 %v764_v2  ;;  %v650_v11 = vadd.f32 %v649_v6, %v2427_v28 }
  0xf2   : > { %v734_v8 = vadd.f32 %v733_v5, %v705_v4  ;;  %v679_v16 = vadd.f32 %v678_v7, %v650_v11 }
  0xf4   : > { %v753_v10 = vmax.f32 %v734_v8, 0.0  ;;  %v754_v21 = vmax.f32 %v679_v16, 0.0 }
  0xf6   : > { %v765_v12 = vpack.c.bf16 %v753_v10, %v751_v9 }
  0xf7   : > { %v707_v13 = vpop.f32.mrf.mxu2  ;;  %v651_v15 = vpop.f32.mrf.mxu0 }
  0xf8   : > { %v736_v14 = vpop.f32.mrf.mxu3  ;;  %1013 = vmatmul.bf16.gmra.mxu1 %v765_v12  ;;  %1071 = vmatmul.bf16.gmra.mxu3 %v765_v12  ;;  %v652_v17 = vadd.f32 %v651_v15, %v2427_v28  ;;  %v680_v18 = vpop.f32.mrf.mxu1  ;;  %v708_v20 = vadd.f32 %v707_v13, %v2430_v33 }
  0xfa   : > { %v681_v19 = vadd.f32 %v680_v18, %v652_v17  ;;  %v737_v25 = vadd.f32 %v736_v14, %v708_v20 }
  0xfc   : > { %v756_v22 = vmax.f32 %v681_v19, 0.0  ;;  %v755_v32 = vmax.f32 %v737_v25, 0.0 }
  0xfe   : > { %v766_v24 = vpack.c.bf16 %v756_v22, %v754_v21 }
  0xff   : > { %v709_v23 = vpop.f32.mrf.mxu2  ;;  %v654_v29 = vpop.f32.mrf.mxu0 }
 0x100   : > { %v710_v26 = vadd.f32 %v709_v23, %v2430_v33  ;;  %v738_v27 = vpop.f32.mrf.mxu3  ;;  %v683_v30 = vpop.f32.mrf.mxu1  ;;  %989 = vmatmul.bf16.gmra.mxu0 %v766_v24  ;;  %1047 = vmatmul.bf16.gmra.mxu2 %v766_v24  ;;  %v655_v35 = vadd.f32 %v654_v29, %v2427_v28 }
 0x102   : > { %v739_v31 = vadd.f32 %v738_v27, %v710_v26  ;;  %v684_v40 = vadd.f32 %v683_v30, %v655_v35 }
 0x104   : > { %v757_v34 = vmax.f32 %v739_v31, 0.0  ;;  %v758_v45 = vmax.f32 %v684_v40, 0.0 }
 0x106   : > { %v767_v36 = vpack.c.bf16 %v757_v34, %v755_v32 }
 0x107   : > { %v712_v37 = vpop.f32.mrf.mxu2  ;;  %v656_v39 = vpop.f32.mrf.mxu0 }
 0x108   : > { %v741_v38 = vpop.f32.mrf.mxu3  ;;  %1018 = vmatmul.bf16.gmra.mxu1 %v767_v36  ;;  %1076 = vmatmul.bf16.gmra.mxu3 %v767_v36  ;;  %v657_v41 = vadd.f32 %v656_v39, %v2427_v28  ;;  %v685_v42 = vpop.f32.mrf.mxu1  ;;  %v713_v44 = vadd.f32 %v712_v37, %v2430_v33  ;;  %v802_v28 = vld [vmem:[%s379_s12] sm:$0x3] }
 0x109   : > { %v803_v56 = vunpack.c.l.bf16 %v802_v28 }
 0x10a   : > { %v686_v43 = vadd.f32 %v685_v42, %v657_v41  ;;  %v742_v49 = vadd.f32 %v741_v38, %v713_v44 }
 0x10b   : > { %v805_v58 = vperm.slane %v803_v56, 0  ;;  %v806_v59 = vperm.slane %v803_v56, 2 }
 0x10c   : > { %v760_v46 = vmax.f32 %v686_v43, 0.0  ;;  %v759_v53 = vmax.f32 %v742_v49, 0.0 }
 0x10d   : > { %v2454_v62 = vperm.slane %v806_v59, 0 }
 0x10e   : > { %v768_v48 = vpack.c.bf16 %v760_v46, %v758_v45 }
 0x10f   : > { %v714_v47 = vpop.f32.mrf.mxu2 }
 0x110   : > { %v715_v50 = vadd.f32 %v714_v47, %v2430_v33  ;;  %v743_v51 = vpop.f32.mrf.mxu3  ;;  %994 = vmatmul.bf16.gmra.mxu0 %v768_v48  ;;  %1052 = vmatmul.bf16.gmra.mxu2 %v768_v48  ;;  %v2452_v33 = vperm.slane %v805_v58, 0 }
 0x112   : > { %v744_v52 = vadd.f32 %v743_v51, %v715_v50 }
 0x114   : > { %v761_v54 = vmax.f32 %v744_v52, 0.0 }
 0x116   : > { %v769_v55 = vpack.c.bf16 %v761_v54, %v759_v53 }
 0x118   : > { %1023 = vmatmul.bf16.gmra.mxu1 %v769_v55  ;;  %1081 = vmatmul.bf16.gmra.mxu3 %v769_v55 }
 0x15d   : > { %v980_v57 = vpop.f32.mrf.mxu0 }
 0x15e   : > { %v981_v0 = vadd.f32 %v980_v57, %v2452_v33 }
 0x163   : > { %v1038_v60 = vpop.f32.mrf.mxu2 }
 0x164   : > { %v1039_v2 = vadd.f32 %v1038_v60, %v2454_v62 }
 0x165   : > { %v1009_v61 = vpop.f32.mrf.mxu1  ;;  %v982_v63 = vpop.f32.mrf.mxu0 }
 0x166   : > { %v2457_v1 = vadd.f32 %v1009_v61, %v981_v0  ;;  %v983_v10 = vadd.f32 %v982_v63, %v2452_v33 }
 0x168   : > { %v1087_v8 = vmul.f32 %v2457_v1, %v2457_v1 }
 0x16b   : > { %v1067_v3 = vpop.f32.mrf.mxu3  ;;  %v1040_v5 = vpop.f32.mrf.mxu2 }
 0x16c   : > { %v2460_v4 = vadd.f32 %v1067_v3, %v1039_v2  ;;  %v1041_v13 = vadd.f32 %v1040_v5, %v2454_v62 }
 0x16d   : > { %v1011_v6 = vpop.f32.mrf.mxu1  ;;  %v985_v7 = vpop.f32.mrf.mxu0 }
 0x16e   : > { %v1088_v9 = vmul.f32 %v2460_v4, %v2460_v4  ;;  %v2467_v12 = vadd.f32 %v1011_v6, %v983_v10  ;;  %v986_v21 = vadd.f32 %v985_v7, %v2452_v33 }
 0x170   : > { %v1103_v11 = vadd.f32 %v1088_v9, %v1087_v8  ;;  %v1089_v18 = vmul.f32 %v2467_v12, %v2467_v12 }
 0x172   : > { %1104 = vadd.xlane.f32.xlu0 %v1103_v11 }
 0x173   : > { %v1069_v14 = vpop.f32.mrf.mxu3  ;;  %v1043_v16 = vpop.f32.mrf.mxu2 }
 0x174   : > { %v2470_v15 = vadd.f32 %v1069_v14, %v1041_v13  ;;  %v1044_v24 = vadd.f32 %v1043_v16, %v2454_v62 }
 0x175   : > { %v1014_v17 = vpop.f32.mrf.mxu1  ;;  %v987_v20 = vpop.f32.mrf.mxu0 }
 0x176   : > { %v1090_v19 = vmul.f32 %v2470_v15, %v2470_v15  ;;  %v2477_v23 = vadd.f32 %v1014_v17, %v986_v21  ;;  %v988_v34 = vadd.f32 %v987_v20, %v2452_v33 }
 0x178   : > { %v1106_v22 = vadd.f32 %v1090_v19, %v1089_v18  ;;  %v1091_v30 = vmul.f32 %v2477_v23, %v2477_v23 }
 0x17a   : > { %1107 = vadd.xlane.f32.xlu0 %v1106_v22 }
 0x17b   : > { %v1072_v25 = vpop.f32.mrf.mxu3  ;;  %v1045_v27 = vpop.f32.mrf.mxu2 }
 0x17c   : > { %v2480_v26 = vadd.f32 %v1072_v25, %v1044_v24  ;;  %v1046_v37 = vadd.f32 %v1045_v27, %v2454_v62 }
 0x17d   : > { %v1016_v29 = vpop.f32.mrf.mxu1  ;;  %v990_v32 = vpop.f32.mrf.mxu0 }
 0x17e   : > { %v1092_v31 = vmul.f32 %v2480_v26, %v2480_v26  ;;  %v2487_v36 = vadd.f32 %v1016_v29, %v988_v34  ;;  %v991_v44 = vadd.f32 %v990_v32, %v2452_v33 }
 0x180   : > { %v1109_v35 = vadd.f32 %v1092_v31, %v1091_v30  ;;  %v1093_v42 = vmul.f32 %v2487_v36, %v2487_v36 }
 0x182   : > { %1110 = vadd.xlane.f32.xlu1 %v1109_v35 }
 0x183   : > { %v1074_v38 = vpop.f32.mrf.mxu3  ;;  %v1048_v40 = vpop.f32.mrf.mxu2 }
 0x184   : > { %v2490_v39 = vadd.f32 %v1074_v38, %v1046_v37  ;;  %v1049_v48 = vadd.f32 %v1048_v40, %v2454_v62 }
 0x185   : > { %v1019_v41 = vpop.f32.mrf.mxu1  ;;  %v992_v46 = vpop.f32.mrf.mxu0 }
 0x186   : > { %v1094_v43 = vmul.f32 %v2490_v39, %v2490_v39  ;;  %v2497_v47 = vadd.f32 %v1019_v41, %v991_v44  ;;  %v993_v55 = vadd.f32 %v992_v46, %v2452_v33 }
 0x188   : > { %v1112_v45 = vadd.f32 %v1094_v43, %v1093_v42  ;;  %v1095_v53 = vmul.f32 %v2497_v47, %v2497_v47 }
 0x18a   : > { %1113 = vadd.xlane.f32.xlu1 %v1112_v45 }
 0x18b   : > { %v1077_v49 = vpop.f32.mrf.mxu3  ;;  %v1050_v51 = vpop.f32.mrf.mxu2 }
 0x18c   : > { %v2500_v50 = vadd.f32 %v1077_v49, %v1049_v48  ;;  %v1051_v57 = vadd.f32 %v1050_v51, %v2454_v62 }
 0x18d   : > { %v1021_v52 = vpop.f32.mrf.mxu1  ;;  %v995_v58 = vpop.f32.mrf.mxu0 }
 0x18e   : > { %v1096_v54 = vmul.f32 %v2500_v50, %v2500_v50  ;;  %v2507_v56 = vadd.f32 %v1021_v52, %v993_v55  ;;  %v996_v3 = vadd.f32 %v995_v58, %v2452_v33 }
 0x190   : > { %v1115_v28 = vadd.f32 %v1096_v54, %v1095_v53  ;;  %v1097_v0 = vmul.f32 %v2507_v56, %v2507_v56 }
 0x192   : > { %1116 = vadd.xlane.f32.xlu2 %v1115_v28 }
 0x193   : > { %v1079_v59 = vpop.f32.mrf.mxu3  ;;  %v1053_v63 = vpop.f32.mrf.mxu2 }
 0x194   : > { %v2510_v60 = vadd.f32 %v1079_v59, %v1051_v57  ;;  %v1054_v7 = vadd.f32 %v1053_v63, %v2454_v62 }
 0x195   : > { %v1024_v61 = vpop.f32.mrf.mxu1  ;;  %v997_v10 = vpop.f32.mrf.mxu0 }
 0x196   : > { %v1098_v2 = vmul.f32 %v2510_v60, %v2510_v60  ;;  %v2517_v6 = vadd.f32 %v1024_v61, %v996_v3  ;;  %v998_v17 = vadd.f32 %v997_v10, %v2452_v33 }
 0x198   : > { %v1118_v5 = vadd.f32 %v1098_v2, %v1097_v0  ;;  %v1099_v11 = vmul.f32 %v2517_v6, %v2517_v6 }
 0x19a   : > { %1119 = vadd.xlane.f32.xlu2 %v1118_v5 }
 0x19b   : > { %v1082_v8 = vpop.f32.mrf.mxu3  ;;  %v1055_v16 = vpop.f32.mrf.mxu2 }
 0x19c   : > { %v2520_v9 = vadd.f32 %v1082_v8, %v1054_v7  ;;  %v1056_v20 = vadd.f32 %v1055_v16, %v2454_v62 }
 0x19d   : > { %v1026_v14 = vpop.f32.mrf.mxu1 }
 0x19e   : > { %v1100_v13 = vmul.f32 %v2520_v9, %v2520_v9  ;;  %v2527_v19 = vadd.f32 %v1026_v14, %v998_v17 }
 0x1a0   : > { %v1121_v18 = vadd.f32 %v1100_v13, %v1099_v11  ;;  %v1101_v24 = vmul.f32 %v2527_v19, %v2527_v19 }
 0x1a2   : > { %1122 = vadd.xlane.f32.xlu0 %v1121_v18 }
 0x1a3   : > { %v1084_v21 = vpop.f32.mrf.mxu3 }
 0x1a4   : > { %v2530_v22 = vadd.f32 %v1084_v21, %v1056_v20 }
 0x1a6   : > { %v1102_v25 = vmul.f32 %v2530_v22, %v2530_v22 }
 0x1a8   : > { %v1124_v27 = vadd.f32 %v1102_v25, %v1101_v24 }
 0x1aa   : > { %1125 = vadd.xlane.f32.xlu1 %v1124_v27 }
 0x1e5   : > { %v1105_v29 = vpop.xlane.xlu0 %1104 }
 0x1e6   : > { %1909 = vrsqrt.f32 %v1105_v29  ;;  %vm1134_vm0 = vcmp.eq.f32.partialorder %v1105_v29, inf  ;;  %v1137_v43 = vand.u32 2147483648, %v1105_v29  ;;  %vm1136_vm1 = vcmp.eq.f32.partialorder %v1105_v29, 0.0 }
 0x1ec   : > { %v1910_v33 = vpop.eup %1909 }
 0x1ed   : > { %v1128_v30 = vmul.f32 %v1910_v33, %v1105_v29  ;;  %v1108_v31 = vpop.xlane.xlu0 %1107 }
 0x1ee   : > { %1911 = vrsqrt.f32 %v1108_v31  ;;  %vm1146_vm2 = vcmp.eq.f32.partialorder %v1108_v31, inf  ;;  %v1149_v57 = vand.u32 2147483648, %v1108_v31  ;;  %vm1148_vm3 = vcmp.eq.f32.partialorder %v1108_v31, 0.0 }
 0x1ef   : > { %v1129_v32 = vmul.f32 %v1910_v33, %v1128_v30 }
 0x1f1   : > { %v1130_v62 = vmul.f32 0.5, %v1129_v32 }
 0x1f3   : > { %v1131_v34 = vsub.f32 1.5, %v1130_v62 }
 0x1f4   : > { %v1912_v35 = vpop.eup %1911 }
 0x1f5   : > { %v1132_v37 = vmul.f32 %v1910_v33, %v1131_v34  ;;  %v1140_v38 = vmul.f32 %v1912_v35, %v1108_v31  ;;  %v1111_v40 = vpop.xlane.xlu1 %1110 }
 0x1f6   : > { %1913 = vrsqrt.f32 %v1111_v40  ;;  %vm1158_vm4 = vcmp.eq.f32.partialorder %v1111_v40, inf  ;;  %v1161_v17 = vand.u32 2147483648, %v1111_v40  ;;  %vm1160_vm5 = vcmp.eq.f32.partialorder %v1111_v40, 0.0 }
 0x1f7   : > { %v1133_v41 = vmul.f32 %v1132_v37, %v1105_v29  ;;  %v1141_v42 = vmul.f32 %v1912_v35, %v1140_v38 }
 0x1f9   : > { %v1135_v44 = vsel %vm1134_vm0, %v1105_v29, %v1133_v41  ;;  %v1142_v45 = vmul.f32 0.5, %v1141_v42 }
 0x1fa   : > { %v1138_v46 = vsel %vm1136_vm1, %v1137_v43, %v1135_v44 }
 0x1fb   : > { %v1223_v48 = vadd.f32 1e-07, %v1138_v46  ;;  %v1143_v49 = vsub.f32 1.5, %v1142_v45 }
 0x1fc   : > { %v1914_v51 = vpop.eup %1913 }
 0x1fd   : > { %1915 = vrcp.f32 %v1223_v48  ;;  %v1144_v52 = vmul.f32 %v1912_v35, %v1143_v49  ;;  %v1152_v53 = vmul.f32 %v1914_v51, %v1111_v40  ;;  %v1114_v54 = vpop.xlane.xlu1 %1113 }
 0x1fe   : > { %1917 = vrsqrt.f32 %v1114_v54  ;;  %vm1170_vm6 = vcmp.eq.f32.partialorder %v1114_v54, inf  ;;  %v1173_v35 = vand.u32 2147483648, %v1114_v54  ;;  %vm1172_vm7 = vcmp.eq.f32.partialorder %v1114_v54, 0.0 }
 0x1ff   : > { %v1145_v55 = vmul.f32 %v1144_v52, %v1108_v31  ;;  %v1153_v28 = vmul.f32 %v1914_v51, %v1152_v53 }
 0x201   : > { %v1147_v58 = vsel %vm1146_vm2, %v1108_v31, %v1145_v55  ;;  %v1154_v59 = vmul.f32 0.5, %v1153_v28 }
 0x202   : > { %v1150_v61 = vsel %vm1148_vm3, %v1149_v57, %v1147_v58 }
 0x203   : > { %v1916_v63 = vpop.eup %1915  ;;  %v1224_v0 = vadd.f32 1e-07, %v1150_v61  ;;  %v1155_v2 = vsub.f32 1.5, %v1154_v59 }
 0x204   : > { %v1918_v3 = vpop.eup %1917  ;;  %v1239_v5 = vmul.f32 %v1916_v63, %v2457_v1  ;;  %v1240_v7 = vmul.f32 %v1916_v63, %v2460_v4 }
 0x205   : > { %1919 = vrcp.f32 %v1224_v0  ;;  %v1156_v8 = vmul.f32 %v1914_v51, %v1155_v2  ;;  %v1164_v10 = vmul.f32 %v1918_v3, %v1114_v54  ;;  %v1117_v11 = vpop.xlane.xlu2 %1116 }
 0x206   : > { %v1255_v13 = vpack.c.bf16 %v1240_v7, %v1239_v5  ;;  %1921 = vrsqrt.f32 %v1117_v11  ;;  %vm1182_vm8 = vcmp.eq.f32.partialorder %v1117_v11, inf  ;;  %v1185_v53 = vand.u32 2147483648, %v1117_v11 }
 0x207   : > { %v1157_v14 = vmul.f32 %v1156_v8, %v1111_v40  ;;  %v1165_v16 = vmul.f32 %v1918_v3, %v1164_v10  ;;  %vm1184_vm9 = vcmp.eq.f32.partialorder %v1117_v11, 0.0 }
 0x208   : > { %1263 = vst [vmem:[%s2540_s10] sm:$0xff] %v1255_v13 }
 0x209   : > { %v1159_v18 = vsel %vm1158_vm4, %v1111_v40, %v1157_v14  ;;  %v1166_v1 = vmul.f32 0.5, %v1165_v16 }
 0x20a   : > { %v1162_v4 = vsel %vm1160_vm5, %v1161_v17, %v1159_v18 }
 0x20b   : > { %v1920_v20 = vpop.eup %1919  ;;  %v1225_v21 = vadd.f32 1e-07, %v1162_v4  ;;  %v1167_v24 = vsub.f32 1.5, %v1166_v1 }
 0x20c   : > { %v1922_v25 = vpop.eup %1921  ;;  %v1241_v27 = vmul.f32 %v1920_v20, %v2467_v12  ;;  %v1242_v29 = vmul.f32 %v1920_v20, %v2470_v15 }
 0x20d   : > { %1923 = vrcp.f32 %v1225_v21  ;;  %v1168_v33 = vmul.f32 %v1918_v3, %v1167_v24  ;;  %v1176_v30 = vmul.f32 %v1922_v25, %v1117_v11  ;;  %v1120_v31 = vpop.xlane.xlu2 %1119 }
 0x20e   : > { %v1256_v32 = vpack.c.bf16 %v1242_v29, %v1241_v27  ;;  %1925 = vrsqrt.f32 %v1120_v31  ;;  %vm1194_vm10 = vcmp.eq.f32.partialorder %v1120_v31, inf  ;;  %v1197_v8 = vand.u32 2147483648, %v1120_v31 }
 0x20f   : > { %v1169_v62 = vmul.f32 %v1168_v33, %v1114_v54  ;;  %v1177_v34 = vmul.f32 %v1922_v25, %v1176_v30  ;;  %vm1196_vm11 = vcmp.eq.f32.partialorder %v1120_v31, 0.0 }
 0x210   : > { %1264 = vst [vmem:[%s2540_s10 + $0x8] sm:$0xff] %v1256_v32 }
 0x211   : > { %v1171_v37 = vsel %vm1170_vm6, %v1114_v54, %v1169_v62  ;;  %v1178_v38 = vmul.f32 0.5, %v1177_v34 }
 0x212   : > { %v1174_v40 = vsel %vm1172_vm7, %v1173_v35, %v1171_v37 }
 0x213   : > { %v1924_v41 = vpop.eup %1923  ;;  %v1226_v12 = vadd.f32 1e-07, %v1174_v40  ;;  %v1179_v42 = vsub.f32 1.5, %v1178_v38 }
 0x214   : > { %v1926_v15 = vpop.eup %1925  ;;  %v1243_v43 = vmul.f32 %v1924_v41, %v2477_v23  ;;  %v1244_v44 = vmul.f32 %v1924_v41, %v2480_v26 }
 0x215   : > { %1927 = vrcp.f32 %v1226_v12  ;;  %v1180_v45 = vmul.f32 %v1922_v25, %v1179_v42  ;;  %v1188_v46 = vmul.f32 %v1926_v15, %v1120_v31  ;;  %v1123_v48 = vpop.xlane.xlu0 %1122 }
 0x216   : > { %v1257_v49 = vpack.c.bf16 %v1244_v44, %v1243_v43  ;;  %1929 = vrsqrt.f32 %v1123_v48  ;;  %vm1206_vm12 = vcmp.eq.f32.partialorder %v1123_v48, inf  ;;  %v1209_v25 = vand.u32 2147483648, %v1123_v48 }
 0x217   : > { %v1181_v51 = vmul.f32 %v1180_v45, %v1117_v11  ;;  %v1189_v52 = vmul.f32 %v1926_v15, %v1188_v46  ;;  %vm1208_vm13 = vcmp.eq.f32.partialorder %v1123_v48, 0.0 }
 0x218   : > { %1265 = vst [vmem:[%s2540_s10 + $0x10] sm:$0xff] %v1257_v49 }
 0x219   : > { %v1183_v54 = vsel %vm1182_vm8, %v1117_v11, %v1181_v51  ;;  %v1190_v55 = vmul.f32 0.5, %v1189_v52 }
 0x21a   : > { %v1186_v28 = vsel %vm1184_vm9, %v1185_v53, %v1183_v54 }
 0x21b   : > { %v1928_v57 = vpop.eup %1927  ;;  %v1227_v23 = vadd.f32 1e-07, %v1186_v28  ;;  %v1191_v58 = vsub.f32 1.5, %v1190_v55 }
 0x21c   : > { %v1930_v26 = vpop.eup %1929  ;;  %v1245_v59 = vmul.f32 %v1928_v57, %v2487_v36  ;;  %v1246_v61 = vmul.f32 %v1928_v57, %v2490_v39 }
 0x21d   : > { %1931 = vrcp.f32 %v1227_v23  ;;  %v1192_v63 = vmul.f32 %v1926_v15, %v1191_v58  ;;  %v1200_v0 = vmul.f32 %v1930_v26, %v1123_v48  ;;  %v1126_v2 = vpop.xlane.xlu1 %1125 }
 0x21e   : > { %v1258_v3 = vpack.c.bf16 %v1246_v61, %v1245_v59  ;;  %1933 = vrsqrt.f32 %v1126_v2  ;;  %vm1218_vm14 = vcmp.eq.f32.partialorder %v1126_v2, inf  ;;  %v1221_v37 = vand.u32 2147483648, %v1126_v2 }
 0x21f   : > { %v1193_v5 = vmul.f32 %v1192_v63, %v1120_v31  ;;  %v1201_v7 = vmul.f32 %v1930_v26, %v1200_v0  ;;  %vm1220_vm15 = vcmp.eq.f32.partialorder %v1126_v2, 0.0 }
 0x220   : > { %1266 = vst [vmem:[%s2540_s10 + $0x18] sm:$0xff] %v1258_v3 }
 0x221   : > { %v1195_v10 = vsel %vm1194_vm10, %v1120_v31, %v1193_v5  ;;  %v1202_v11 = vmul.f32 0.5, %v1201_v7 }
 0x222   : > { %v1198_v13 = vsel %vm1196_vm11, %v1197_v8, %v1195_v10 }
 0x223   : > { %v1932_v14 = vpop.eup %1931  ;;  %v1228_v36 = vadd.f32 1e-07, %v1198_v13  ;;  %v1203_v16 = vsub.f32 1.5, %v1202_v11 }
 0x224   : > { %v1934_v39 = vpop.eup %1933  ;;  %v1247_v17 = vmul.f32 %v1932_v14, %v2497_v47  ;;  %v1248_v18 = vmul.f32 %v1932_v14, %v2500_v50 }
 0x225   : > { %1935 = vrcp.f32 %v1228_v36  ;;  %v1204_v1 = vmul.f32 %v1930_v26, %v1203_v16  ;;  %v1212_v4 = vmul.f32 %v1934_v39, %v1126_v2 }
 0x226   : > { %v1259_v20 = vpack.c.bf16 %v1248_v18, %v1247_v17 }
 0x227   : > { %v1205_v21 = vmul.f32 %v1204_v1, %v1123_v48  ;;  %v1213_v24 = vmul.f32 %v1934_v39, %v1212_v4 }
 0x228   : > { %1267 = vst [vmem:[%s2540_s10 + $0x20] sm:$0xff] %v1259_v20 }
 0x229   : > { %v1207_v27 = vsel %vm1206_vm12, %v1123_v48, %v1205_v21  ;;  %v1214_v29 = vmul.f32 0.5, %v1213_v24 }
 0x22a   : > { %v1210_v33 = vsel %vm1208_vm13, %v1209_v25, %v1207_v27 }
 0x22b   : > { %v1936_v30 = vpop.eup %1935  ;;  %v1229_v31 = vadd.f32 1e-07, %v1210_v33  ;;  %v1215_v32 = vsub.f32 1.5, %v1214_v29 }
 0x22c   : > { %v1249_v47 = vmul.f32 %v1936_v30, %v2507_v56  ;;  %v1250_v50 = vmul.f32 %v1936_v30, %v2510_v60 }
 0x22d   : > { %1937 = vrcp.f32 %v1229_v31  ;;  %v1216_v62 = vmul.f32 %v1934_v39, %v1215_v32 }
 0x22e   : > { %v1260_v34 = vpack.c.bf16 %v1250_v50, %v1249_v47 }
 0x22f   : > { %v1217_v35 = vmul.f32 %v1216_v62, %v1126_v2 }
 0x230   : > { %1268 = vst [vmem:[%s2540_s10 + $0x28] sm:$0xff] %v1260_v34 }
 0x231   : > { %v1219_v38 = vsel %vm1218_vm14, %v1126_v2, %v1217_v35 }
 0x232   : > { %v1222_v40 = vsel %vm1220_vm15, %v1221_v37, %v1219_v38 }
 0x233   : > { %v1938_v41 = vpop.eup %1937  ;;  %v1230_v12 = vadd.f32 1e-07, %v1222_v40 }
 0x234   : > { %v1251_v56 = vmul.f32 %v1938_v41, %v2517_v6  ;;  %v1252_v60 = vmul.f32 %v1938_v41, %v2520_v9 }
 0x235   : > { %1939 = vrcp.f32 %v1230_v12 }
 0x236   : > { %v1261_v42 = vpack.c.bf16 %v1252_v60, %v1251_v56 }
 0x238   : > { %1269 = vst [vmem:[%s2540_s10 + $0x30] sm:$0xff] %v1261_v42 }
 0x23b   : > { %v1940_v15 = vpop.eup %1939 }
 0x23c   : > { %v1253_v43 = vmul.f32 %v1940_v15, %v2527_v19  ;;  %v1254_v44 = vmul.f32 %v1940_v15, %v2530_v22 }
 0x23e   : > { %v1262_v6 = vpack.c.bf16 %v1254_v44, %v1253_v43 }
 0x240   : > { %1270 = vst [vmem:[%s2540_s10 + $0x38] sm:$0xff] %v1262_v6 }
 0x241   : > { %2058 = shalt.err (!%p2055_p12)
}
 0x242   : > { %s2121_s18 = smov 128   ;;  %s2122_s9 = smov 8  }
 0x243   : > { %1839 = dma.vmem_to_hbm [thread:$0]  (%p2204_p9), %s1288_s25, 1024, %s1290_s16, %s1272_s21, %s2121_s18, %s2121_s18, %s2122_s9  }
 0x244 PF: > { %s2623_s13 = sld [smem:[#allocation12_spill]]  ;;  %p1856_p13 = scmp.ge.s32.totalorder %s2117_s23, 2 }
 0x246   : > { %p1852_p0 = pnand %p1856_p13, %p2211_p11 }
 0x248   : > { %p1853_p1 = pneg %p1852_p0 }
 0x24a   : > { %s1304_s17 = sand.u32 1, %s2623_s13  }
 0x24b   : > { %s1305_s27 = scalar_lea.sflag [#allocation4], %s1304_s17 }
 0x24c   : > { %2092 = dma.done.wait (%p1853_p1), %s1305_s27, 1024  }
 0x24d   : > { %2094 = vsyncadd (%p1853_p1), %s1305_s27, 4294966272  ;;  %s24_s23 = sadd.s32 1, %s2117_s23   ;;  %s2625_s12 = sld [smem:[#allocation13_spill]] }
 0x24e   : > { %p21_p2 = scmp.ge.s32.totalorder %s24_s23, 7   ;;  %s2626_s20 = sld [smem:[#allocation15_spill]] }
 0x24f   : > { %s2627_s30 = sld [smem:[#allocation14_spill]]  ;;  %s2628_s18 = smov %s2101_s19 }
 0x250   : > { %s2630_s21 = smov %s2113_s22 }
 0x251   :  { %23 = sbr.rel (!%p21_p2) target bundleno = 10 (0xa), region = 115 }
 0x253   : > { %s2629_s19 = smov %s2625_s12 }
 0x255   : > { %s2631_s22 = smov %s2627_s30 }
 0x256   :  { %1311 = vsyncpa [#allocation3], 1 }
 0x257   :  { %1313 = vsyncpa [#allocation3 + $0x1], 1 }
 0x258   :  { %1314 = vsyncpa [#allocation6], 1 }
 0x259   :  { %1316 = vsyncpa [#allocation6 + $0x1], 1 }
 0x25a   :  { %1317 = vsyncpa [#allocation4], 1 }
 0x25b   :  { %1319 = vsyncpa [#allocation4 + $0x1], 1 }

</bundles_post_ra>
